<compile_context>
chip_gen: v7x
topology: tpu7x:2x2x1
jax: 0.10.0
libtpu: 0.0.40
codegen_flags: <defaults>
</compile_context>

<pallas_src>
import jax
import jax.numpy as jnp
from jax.experimental import pallas as pl
from jax.experimental.pallas import tpu as pltpu

KH = KW = 5
CIN = 16
COUT = 120
COUT_PAD = 128      # pad channel-out to a full 128-lane register for dense stores
TM_LARGE = 2048     # row-tile size for the M (= N*OH*OW) dimension when M is large


def _conv_relu_matmul_kernel(p_ref, w_ref, b_ref, o_ref):
    # p_ref: [TM, K] bf16 (streamed)    w_ref: [K, 128] bf16 (VMEM-resident)
    # b_ref: [1, 128] f32 (resident)    o_ref: [TM, 128] f32
    acc = jnp.dot(p_ref[...], w_ref[...], preferred_element_type=jnp.float32)
    o_ref[...] = jnp.maximum(acc + b_ref[...], 0.0).astype(o_ref.dtype)


def _im2col_nhwc_bf16(x_nchw):
    """x: [N, C, H, W] f32 -> bf16 patches [N*OH*OW, KH*KW*C], K ordered (kh, kw, c)."""
    n, c, h, w = x_nchw.shape
    oh, ow = h - KH + 1, w - KW + 1
    # Cast FIRST so the 25x-inflated patch tensor materializes in bf16, not f32.
    x = jnp.transpose(x_nchw.astype(jnp.bfloat16), (0, 2, 3, 1))   # NHWC [N, H, W, C]
    cols = []
    for i in range(KH):
        for j in range(KW):
            cols.append(x[:, i:i + oh, j:j + ow, :])                # [N, OH, OW, C]
    p = jnp.stack(cols, axis=3)                                     # [N, OH, OW, 25, C]
    return p.reshape(n * oh * ow, KH * KW * c), oh, ow


def _round_up(v, m):
    return ((v + m - 1) // m) * m


def _pick_tm(m):
    if m <= 16:
        return m                      # single full block: always layout-legal
    # >= ~4 grid steps so both v7x TensorCores get row tiles and the DMA pipeline has
    # steps to overlap; cap the tile at TM_LARGE rows for large M.
    return max(8, min(TM_LARGE, _round_up(pl.cdiv(m, 4), 8)))


@jax.jit
def c3_forward(x, weight, bias):
    """x: [N, 16, H, W] f32; weight: [120, 16, 5, 5]; bias: [120] -> [N, 120, OH, OW] f32."""
    n = x.shape[0]
    patches, oh, ow = _im2col_nhwc_bf16(x)                   # [M, K] bf16
    m, k = patches.shape

    # weight [COUT, CIN, KH, KW] -> [K, COUT_PAD] with K = (kh, kw, c) matching im2col.
    w_mat = jnp.transpose(weight, (2, 3, 1, 0)).reshape(k, COUT)
    w_mat = jnp.pad(w_mat, ((0, 0), (0, COUT_PAD - COUT))).astype(jnp.bfloat16)
    b_row = jnp.pad(bias, (0, COUT_PAD - COUT)).reshape(1, COUT_PAD).astype(jnp.float32)

    tm = _pick_tm(m)
    grid = (pl.cdiv(m, tm),)

    cost = pl.CostEstimate(
        flops=2 * m * k * COUT_PAD,
        transcendentals=0,
        bytes_accessed=m * k * 2 + k * COUT_PAD * 2 + COUT_PAD * 4 + m * COUT_PAD * 4,
    )

    # VMEM budget with the layout the hardware actually uses: bf16 patch tiles are
    # lane-padded K 400 -> 512 and sublane-padded to a multiple of 16; the f32 output
    # tile is padded to (8, 128) multiples.  Patch/out tiles are double-buffered by the
    # pipeline; weight/bias are small residents (counted twice to be safe) + 2 MiB slack.
    k_pad = _round_up(k, 128)
    patch_tile = _round_up(tm, 16) * k_pad * 2
    out_tile = _round_up(tm, 8) * COUT_PAD * 4
    w_buf = _round_up(k, 16) * COUT_PAD * 2
    b_buf = 8 * COUT_PAD * 4
    vmem_bytes = int(2 * patch_tile + 2 * out_tile + 2 * (w_buf + b_buf) + (2 << 20))

    out = pl.pallas_call(
        _conv_relu_matmul_kernel,
        out_shape=jax.ShapeDtypeStruct((m, COUT_PAD), jnp.float32),
        grid_spec=pltpu.PrefetchScalarGridSpec(
            num_scalar_prefetch=0,
            grid=grid,
            in_specs=[
                pl.BlockSpec((tm, k), lambda i: (i, 0)),          # streamed patch tiles
                pl.BlockSpec((k, COUT_PAD), lambda i: (0, 0)),    # VMEM-resident weight
                pl.BlockSpec((1, COUT_PAD), lambda i: (0, 0)),    # VMEM-resident bias
            ],
            out_specs=pl.BlockSpec((tm, COUT_PAD), lambda i: (i, 0)),
        ),
        compiler_params=pltpu.CompilerParams(
            dimension_semantics=("parallel",),   # shard row tiles across v7x's 2 TCs
            vmem_limit_bytes=vmem_bytes,
        ),
        cost_estimate=cost,
    )(patches, w_mat, b_row)

    # Module contract is NCHW; single fused post-pass: drop lane padding + NHWC -> NCHW.
    return out[:, :COUT].reshape(n, oh, ow, COUT).transpose(0, 3, 1, 2)


if __name__ == "__main__":
    key = jax.random.PRNGKey(0)
    kx, kw_, kb = jax.random.split(key, 3)

    # Small shapes consistent with the module: N=2, Cin=16, H=W=8 -> out [2, 120, 4, 4].
    x = jax.random.normal(kx, (2, CIN, 8, 8), dtype=jnp.float32)

    # Deterministic synthetic params (PyTorch default init style: U(-b, b)).
    fan_in = CIN * KH * KW
    bound = 1.0 / (fan_in ** 0.5)
    weight = jax.random.uniform(kw_, (COUT, CIN, KH, KW), jnp.float32, -bound, bound)
    bias = jax.random.uniform(kb, (COUT,), jnp.float32, -bound, bound)

    out = jax.block_until_ready(c3_forward(x, weight, bias))

    # Reference: XLA conv + bias + ReLU in f32.  Kernel uses bf16 operands with f32
    # accumulation -> bf16-appropriate tolerance.
    ref = jax.lax.conv_general_dilated(
        x, weight, window_strides=(1, 1), padding="VALID",
        dimension_numbers=("NCHW", "OIHW", "NCHW"))
    ref = jnp.maximum(ref + bias[None, :, None, None], 0.0)

    assert out.shape == (2, COUT, 4, 4), out.shape
    max_err = float(jnp.max(jnp.abs(out - ref)))
    assert jnp.allclose(out, ref, atol=5e-2, rtol=5e-2), max_err

    print("KERNEL_OK")
</pallas_src>

<mosaic_0001>
module attributes {stable_mosaic.version = 11 : i64} {
  func.func @_conv_relu_matmul_kernel(%arg0: i32, %arg1: memref<8x400xbf16, #tpu.memory_space<vmem>>, %arg2: memref<400x128xbf16, #tpu.memory_space<vmem>>, %arg3: memref<1x128xf32, #tpu.memory_space<vmem>>, %arg4: memref<8x128xf32, #tpu.memory_space<vmem>>) attributes {dimension_semantics = [#tpu.dimension_semantics<parallel>], iteration_bounds = array<i64: 4>, scalar_prefetch = 0 : i64, scratch_operands = 0 : i64, tpu.core_type = #tpu.core_type<tc>, window_params = [{transform_indices = @transform_0, window_bounds = array<i64: 8, 400>}, {pipeline_mode = #tpu.pipeline_mode<synchronous>, transform_indices = @transform_1, window_bounds = array<i64: 400, 128>}, {pipeline_mode = #tpu.pipeline_mode<synchronous>, transform_indices = @transform_2, window_bounds = array<i64: 1, 128>}, {transform_indices = @transform_3, window_bounds = array<i64: 8, 128>}]} {
    %c0 = arith.constant 0 : index
    %c0_0 = arith.constant 0 : index
    %0 = vector.load %arg1[%c0, %c0_0] : memref<8x400xbf16, #tpu.memory_space<vmem>>, vector<8x400xbf16>
    %c0_1 = arith.constant 0 : index
    %c0_2 = arith.constant 0 : index
    %1 = vector.load %arg2[%c0_1, %c0_2] : memref<400x128xbf16, #tpu.memory_space<vmem>>, vector<400x128xbf16>
    %cst = arith.constant dense<0.000000e+00> : vector<8x128xf32>
    %2 = tpu.matmul %0, %1, %cst {dimension_numbers = #tpu.dot_dimension_numbers<[1], [0], [0], [1], [0, 0, 1, 1], [], []>} : vector<8x400xbf16>, vector<400x128xbf16>, vector<8x128xf32> -> vector<8x128xf32>
    %c0_3 = arith.constant 0 : index
    %c0_4 = arith.constant 0 : index
    %3 = vector.load %arg3[%c0_3, %c0_4] : memref<1x128xf32, #tpu.memory_space<vmem>>, vector<1x128xf32>
    %4 = vector.broadcast %3 : vector<1x128xf32> to vector<8x128xf32>
    %5 = arith.addf %2, %4 : vector<8x128xf32>
    %cst_5 = arith.constant 0.000000e+00 : f32
    %6 = vector.broadcast %cst_5 : f32 to vector<8x128xf32>
    %7 = arith.maximumf %5, %6 : vector<8x128xf32>
    %c0_6 = arith.constant 0 : index
    %c0_7 = arith.constant 0 : index
    %8 = vector.load %arg4[%c0_6, %c0_7] : memref<8x128xf32, #tpu.memory_space<vmem>>, vector<8x128xf32>
    tpu.vector_store %arg4[%c0_6, %c0_7], %7 {strides = array<i32>} : memref<8x128xf32, #tpu.memory_space<vmem>>, vector<8x128xf32>,
    return
  }
  func.func @transform_0(%arg0: i32) -> (i32, i32) {
    %c0_i32 = arith.constant 0 : i32
    %c0_i32_0 = arith.constant 0 : i32
    return %arg0, %c0_i32 : i32, i32
  }
  func.func @transform_1(%arg0: i32) -> (i32, i32) {
    %c0_i32 = arith.constant 0 : i32
    %c0_i32_0 = arith.constant 0 : i32
    %c0_i32_1 = arith.constant 0 : i32
    return %c0_i32, %c0_i32_0 : i32, i32
  }
  func.func @transform_2(%arg0: i32) -> (i32, i32) {
    %c0_i32 = arith.constant 0 : i32
    %c0_i32_0 = arith.constant 0 : i32
    %c0_i32_1 = arith.constant 0 : i32
    return %c0_i32, %c0_i32_0 : i32, i32
  }
  func.func @transform_3(%arg0: i32) -> (i32, i32) {
    %c0_i32 = arith.constant 0 : i32
    %c0_i32_0 = arith.constant 0 : i32
    return %arg0, %c0_i32 : i32, i32
  }
}

</mosaic_0001>

<bundles_post_ra>
// kernel: c3_forward.1
= control target key start
LH: loop header
LB: loop body
LE: loop exit
PB: predicated region body
PF: predicated region fallthrough
CT: control target
= control target key end

     0   :  { %8 = vsyncpa [#allocation3], 0  ;;  %s958_s0 = inlined_call_operand.vmem [shape: bf16[32,400], index: 0, kind: input, shape index: {}]   ;;  %s959_s1 = inlined_call_operand.vmem [shape: bf16[400,128], index: 1, kind: input, shape index: {}]   ;;  %s960_s2 = inlined_call_operand.vmem [shape: f32[1,128], index: 2, kind: input, shape index: {}]   ;;  %s961_s3 = inlined_call_operand.hbm [shape: f32[32,128], index: 3, kind: output, shape index: {}]  }
   0x1   :  { %10 = vsyncpa [#allocation3 + $0x1], 0  ;;  %s771_s12 = smov 0   ;;  %s773_s13 = smov 0  }
   0x2   :  { %s775_s14 = smov 0   ;;  %s777_s15 = smov 0  }
   0x3 LB: > { %s792_s16 = sadd.s32 4294967295, %s747_s15   ;;  %s551_s17 = sadd.s32 4294967294, %s747_s15   ;;  %s747_s15 = sphi %s777_s15, %s967_s15   ;;  %s743_s14 = sphi %s775_s14, %s966_s14   ;;  %s739_s13 = sphi %s773_s13, %s965_s13   ;;  %s735_s12 = sphi %s771_s12, %s964_s12  }
   0x4   : > { %s796_s18 = sadd.s32 1, %s747_s15   ;;  %s91_s19 = sadd.s32 1, %s743_s14 }
   0x5   : > { %s88_s20 = ssub.s32 %s747_s15, %s796_s18  ;;  %p101_p0 = scmp.ne.s32.totalorder %s743_s14, %s739_s13 }
   0x6   : > { %p89_p1 = scmp.eq.s32.totalorder %s88_s20, 0  ;;  %p102_p2 = scmp.eq.s32.totalorder %s792_s16, 3 }
   0x7   : > { %p107_p3 = scmp.ne.s32.totalorder %s739_s13, %s735_s12  ;;  %p108_p4 = scmp.eq.s32.totalorder %s551_s17, 3 }
   0x8   : > { %s807_s21 = scalar_select %p89_p1, %s743_s14, %s91_s19  }
   0x9   : > { %p809_p5 = por %p102_p2, %p101_p0  ;;  %p813_p6 = por %p108_p4, %p107_p3 }
   0xa   : > { %p554_p7 = scmp.ge.s32.totalorder %s747_s15, 1  ;;  %p140_p8 = scmp.lt.s32.totalorder %s747_s15, 5 }
   0xc   : > { %p141_p9 = pnand %p554_p7, %p140_p8 }
   0xd   : > { %v656_v0 = vld [vmem:[%s959_s1 + $0x40] sm:$0xff] (!%p141_p9)   ;;  %v749_v1 = vmov (!%p141_p9), 0   ;;  %v659_v4 = vld [vmem:[%s959_s1 + $0x48] sm:$0xff] (!%p141_p9)   ;;  %v662_v7 = vld [vmem:[%s959_s1 + $0x50] sm:$0xff] (!%p141_p9)   ;;  %p164_p10 = scmp.lt.s32.totalorder (!%p141_p9), %s792_s16, 3  ;;  %vm392_vm0 = vcmask (!%p141_p9), 130048  }
   0xe   : > { %144 = sbr.rel (%p141_p9) target bundleno = 282 (0x11a), region = 32  ;;  %436 = vmatprep.subr.bf16.mxu1 (!%p141_p9), %v749_v1  ;;  %v657_v2 = vld [vmem:[%s959_s1 + $0x80] sm:$0xff] (!%p141_p9)   ;;  %594 = vmatprep.subr.bf16.mxu0 (!%p141_p9), %v656_v0  ;;  %v660_v5 = vld [vmem:[%s959_s1 + $0x88] sm:$0xff] (!%p141_p9)   ;;  %v663_v8 = vld [vmem:[%s959_s1 + $0x90] sm:$0xff] (!%p141_p9)   ;;  %s161_s25 = sand.u32 (!%p141_p9), 1, %s739_s13  }
   0xf   : > { %v658_v3 = vld [vmem:[%s959_s1] sm:$0xff] (!%p141_p9)   ;;  %437 = vmatpush1.bf16.msra.mxu1 (!%p141_p9), %v657_v2  ;;  %v661_v6 = vld [vmem:[%s959_s1 + $0x8] sm:$0xff] (!%p141_p9)   ;;  %v664_v9 = vld [vmem:[%s959_s1 + $0x10] sm:$0xff] (!%p141_p9)   ;;  %s555_s26 = sshll.u32 (!%p141_p9), %s161_s25, 3  ;;  %s590_s29 = sshll.u32 (!%p141_p9), %s792_s16, 7 }
  0x10   : > { %595 = vmatpush3.bf16.msra.mxu0 (!%p141_p9), %v658_v3  ;;  %438 = vmatprep.subr.bf16.mxu1 (!%p141_p9), %v749_v1  ;;  %v665_v10 = vld [vmem:[%s959_s1 + $0x58] sm:$0xff] (!%p141_p9)   ;;  %v668_v13 = vld [vmem:[%s959_s1 + $0x60] sm:$0xff] (!%p141_p9)   ;;  %v671_v16 = vld [vmem:[%s959_s1 + $0x68] sm:$0xff] (!%p141_p9)   ;;  %s916_s7 = scalar_lea.hbm (!%p141_p9), %s961_s3, %s590_s29  ;;  %s479_s8 = scalar_lea.sflag (!%p141_p9), [#allocation3], %s161_s25 }
  0x11   : > { %596 = vmatprep.subr.bf16.mxu0 (!%p141_p9), %v659_v4  ;;  %v666_v11 = vld [vmem:[%s959_s1 + $0x98] sm:$0xff] (!%p141_p9)   ;;  %v669_v14 = vld [vmem:[%s959_s1 + $0xa0] sm:$0xff] (!%p141_p9)   ;;  %v672_v17 = vld [vmem:[%s959_s1 + $0xa8] sm:$0xff] (!%p141_p9)  }
  0x12   : > { %v667_v12 = vld [vmem:[%s959_s1 + $0x18] sm:$0xff] (!%p141_p9)   ;;  %v670_v15 = vld [vmem:[%s959_s1 + $0x20] sm:$0xff] (!%p141_p9)   ;;  %v673_v18 = vld [vmem:[%s959_s1 + $0x28] sm:$0xff] (!%p141_p9)  }
  0x13   : > { %439 = vmatpush1.bf16.msra.mxu1 (!%p141_p9), %v660_v5  ;;  %v674_v19 = vld [vmem:[%s959_s1 + $0x70] sm:$0xff] (!%p141_p9)   ;;  %v677_v23 = vld [vmem:[%s959_s1 + $0x78] sm:$0xff] (!%p141_p9)   ;;  %v682_v30 = vld [vmem:[%s959_s1 + $0xc0] sm:$0xff] (!%p141_p9)  }
  0x14   : > { %597 = vmatpush3.bf16.msra.mxu0 (!%p141_p9), %v661_v6  ;;  %440 = vmatprep.subr.bf16.mxu1 (!%p141_p9), %v749_v1  ;;  %v675_v20 = vld [vmem:[%s959_s1 + $0xb0] sm:$0xff] (!%p141_p9)   ;;  %v678_v27 = vld [vmem:[%s959_s1 + $0xb8] sm:$0xff] (!%p141_p9)   ;;  %v558_v34 = vld [vmem:[%s960_s2] ss:$0 sm:$0xff] (!%p141_p9) }
  0x15   : > { %598 = vmatprep.subr.bf16.mxu0 %v662_v7  ;;  %s165_s5 = scalar_select %p164_p10, %s792_s16, 3  ;;  %v676_v21 = vld [vmem:[%s959_s1 + $0x30] sm:$0xff]   ;;  %v679_v28 = vld [vmem:[%s959_s1 + $0x38] sm:$0xff]  }
  0x16   : > { %s750_s16 = smov [#allocation2]  }
  0x17   : > { %441 = vmatpush1.bf16.msra.mxu1 %v663_v8  ;;  %s593_s17 = sshll.u32 %s165_s5, 4  ;;  %s689_s10 = sshll.u32 %s750_s16, 4  ;;  %s690_s10 = int_to_ptr.vmem [resolvable:$false] %s689_s10 }
  0x18   : > { %599 = vmatpush3.bf16.msra.mxu0 %v664_v9  ;;  %442 = vmatprep.subr.bf16.mxu1 %v749_v1  ;;  %s168_s30 = scalar_lea.vmem %s958_s0, %s593_s17  ;;  %s691_s11 = scalar_lea.vmem %s690_s10, 256 }
  0x19   : > { %600 = vmatprep.subr.bf16.mxu0 %v665_v10  ;;  %v170_v22 = vld [vmem:[%s168_s30] sm:$0xff]  ;;  %v171_v25 = vld [vmem:[%s168_s30 + $0x8] sm:$0xff]  ;;  %s163_s30 = scalar_lea.vmem [#allocation2], %s555_s26 }
  0x1a   : > { %v560_v24 = vcombine.high %v170_v22, %v170_v22  ;;  %v562_v26 = vcombine.high %v171_v25, %v171_v25  ;;  %v559_v29 = vcombine.low %v170_v22, %v170_v22  ;;  %v561_v31 = vcombine.low %v171_v25, %v171_v25  ;;  %s492_s4 = sshll.u32 %s163_s30, 4  ;;  %s918_s4 = int_to_ptr.vmem [resolvable:$true] %s492_s4 }
  0x1b   : > { %443 = vmatpush1.bf16.msra.mxu1 %v666_v11  ;;  %s685_s9 = scalar_lea.vmem %s918_s4, 128  ;;  %p692_p0 = scmp.lt.s32.totalorder %s918_s4, %s690_s10 }
  0x1c   : > { %601 = vmatpush3.bf16.msra.mxu0 %v667_v12  ;;  %444 = vmatprep.subr.bf16.mxu1 %v749_v1  ;;  %p686_p11 = scmp.ne.s32.totalorder %s918_s4, %s685_s9  ;;  %p693_p1 = scmp.lt.s32.totalorder %s691_s11, %s685_s9 }
  0x1d   : > { %602 = vmatprep.subr.bf16.mxu0 %v668_v13  ;;  %428 = vmatprep.mubr.bf16.mxu0 %v560_v24 }
  0x1e   : > { %588 = vmatprep.mubr.msk.bf16.mxu1 %vm392_vm0, %v562_v26  ;;  %p687_p12 = pnand %p686_p11, %p809_p5  ;;  %p694_p2 = por %p693_p1, %p692_p0 }
  0x1f   : > { %445 = vmatpush1.bf16.msra.mxu1 %v669_v14 }
  0x20   : > { %603 = vmatpush3.bf16.msra.mxu0 %v670_v15  ;;  %446 = vmatprep.subr.bf16.mxu1 %v749_v1  ;;  %p688_p13 = pneg %p687_p12 }
  0x21   : > { %604 = vmatprep.subr.bf16.mxu0 %v671_v16 }
  0x22   : > { %p695_p3 = pnand %p694_p2, %p688_p13 }
  0x23   : > { %447 = vmatpush1.bf16.msra.mxu1 %v672_v17 }
  0x24   : > { %605 = vmatpush3.bf16.msra.mxu0 %v673_v18  ;;  %448 = vmatprep.subr.bf16.mxu1 %v749_v1 }
  0x25   : > { %606 = vmatprep.subr.bf16.mxu0 %v674_v19 }
  0x27   : > { %449 = vmatpush1.bf16.msra.mxu1 %v675_v20 }
  0x28   : > { %607 = vmatpush3.bf16.msra.mxu0 %v676_v21  ;;  %450 = vmatprep.subr.bf16.mxu1 %v749_v1 }
  0x29   : > { %608 = vmatprep.subr.bf16.mxu0 %v677_v23 }
  0x2b   : > { %451 = vmatpush1.bf16.msra.mxu1 %v678_v27 }
  0x2c   : > { %609 = vmatpush3.bf16.msra.mxu0 %v679_v28  ;;  %452 = vmatprep.subr.bf16.mxu1 %v749_v1 }
  0x2f   : > { %429 = vmatmul.mubr.bf16.vlgmr.msra.gmra.mrb[0].mxu0 %v559_v29  ;;  %453 = vmatpush1.bf16.msra.mxu1 %v682_v30 }
  0x32   : > { %469 = vmatmul.mubr.bf16.vlgmr.msra.gmra.mrb[0].mxu1 %v561_v31 }
 0x102   : > { %v610_v32 = vpop.f32.mrb[0].mxu0 }
 0x103   : > { %v611_v33 = vpop.f32.mrb[1].mxu0 }
 0x104   : > { %v612_v35 = vadd.f32 %v611_v33, %v610_v32  ;;  %v613_v36 = vpop.f32.mrb[2].mxu0 }
 0x105   : > { %v614_v37 = vpop.f32.mrb[3].mxu0  ;;  %v470_v38 = vpop.f32.mrb[0].mxu1 }
 0x106   : > { %v431_v39 = vadd.f32 %v612_v35, %v558_v34  ;;  %v472_v40 = vpop.f32.mrb[1].mxu1 }
 0x107   : > { %v473_v41 = vpop.f32.mrb[2].mxu1 }
 0x108   : > { %v471_v42 = vadd.f32 %v470_v38, %v431_v39  ;;  %v474_v43 = vpop.f32.mrb[3].mxu1 }
 0x10a   : > { %v476_v44 = vmax.f32 %v471_v42, 0.0 }
 0x10c   : > { %477 = vst [vmem:[%s163_s30] sm:$0xff] %v476_v44 }
 0x10d   : > { %698 = shalt.err (!%p695_p3)
}
 0x10e   : > { %s699_s17 = scalar_lea.hbm %s916_s7, 128  ;;  %s703_s24 = scalar_lea.hbm %s961_s3, 512 }
 0x10f   : > { %p700_p4 = scmp.ne.s32.totalorder %s916_s7, %s699_s17  ;;  %p704_p9 = scmp.lt.u32.totalorder %s916_s7, %s961_s3 }
 0x110   : > { %p705_p10 = scmp.lt.u32.totalorder %s703_s24, %s699_s17  ;;  %p707_p12 = scmp.lt.u32.totalorder %s699_s17, %s916_s7 }
 0x111   : > { %p701_p7 = pnand %p700_p4, %p809_p5 }
 0x112   : > { %p706_p11 = por %p705_p10, %p704_p9 }
 0x113   : > { %p702_p8 = pneg %p701_p7 }
 0x114   : > { %p708_p13 = por %p707_p12, %p706_p11 }
 0x116   : > { %p709_p0 = pnand %p708_p13, %p702_p8 }
 0x118   : > { %712 = shalt.err (!%p709_p0)
}
 0x119   : > { %616 = dma.vmem_to_hbm [thread:$0]  (%p809_p5), %s918_s4, 128, %s916_s7, %s479_s8  }
 0x11a PF: > { %p622_p1 = scmp.ge.s32.totalorder %s747_s15, 2  ;;  %s504_s27 = sand.u32 1, %s735_s12  }
 0x11b   : > { %s505_s28 = scalar_lea.sflag [#allocation3], %s504_s27 }
 0x11c   : > { %p619_p2 = pnand %p622_p1, %p813_p6 }
 0x11e   : > { %730 = dma.done.wait (!%p619_p2), %s505_s28, 128  }
 0x11f   : > { %732 = vsyncadd (!%p619_p2), %s505_s28, 4294967168  ;;  %p13_p3 = scmp.ge.s32.totalorder %s796_s18, 6   ;;  %s964_s12 = smov %s739_s13 }
 0x120   : > { %s965_s13 = smov %s743_s14  ;;  %s966_s14 = smov %s807_s21 }
 0x121   : > { %s967_s15 = smov %s796_s18  ;;  %15 = sbr.rel (!%p13_p3) target bundleno = 3 (0x3), region = 67 }
 0x128   :  { %510 = vsyncpa [#allocation3], 1 }
 0x129   :  { %512 = vsyncpa [#allocation3 + $0x1], 1 }

</bundles_post_ra>
